<compile_context>
chip_gen: v5e
topology: v5e:2x2
jax: 0.10.0
libtpu: 0.0.40
codegen_flags: <defaults>
</compile_context>

<pallas_src>
import jax
import jax.numpy as jnp
from jax.experimental import pallas as pl
from jax.experimental.pallas import tpu as pltpu


# ----------------------------- single-step kernel ----------------------------
def ppo_critic_step_kernel(
    x_ref,        # (B, D_in)  bf16
    h_ref,        # (B, H)     f32
    w1_ref,       # (D_in, H)  bf16
    w_ih_ref,     # (H, 3*GP)  bf16   gate g in lanes [g*GP, g*GP+H)
    w_hh_ref,     # (H, 3*GP)  bf16   gate g in lanes [g*GP, g*GP+H)
    misc_ref,     # (5, 3*GP)  f32    rows: b_ih | b_hh | b1 | w2_row | [b2,0..]
    v_ref,        # (B, 1)     f32 out
    hout_ref,     # (B, H)     f32 out
):
    H = h_ref.shape[-1]
    GP = w_hh_ref.shape[-1] // 3      # 128-aligned gate pitch

    h = h_ref[...]
    b_ih = misc_ref[0:1, :]
    b_hh = misc_ref[1:2, :]
    b1 = misc_ref[2:3, 0:H]
    w2_row = misc_ref[3:4, 0:H]
    b2 = misc_ref[4:5, 0:1]

    # fc1 + ReLU (bf16 MXU inputs, f32 accumulation, f32 elementwise)
    x = jnp.dot(x_ref[...], w1_ref[...], preferred_element_type=jnp.float32) + b1
    x = jnp.maximum(x, 0.0)

    # GRUCell (PyTorch gate order r|z|n) — fused (B, 3*GP) matmuls, 128-aligned gates.
    gi = jnp.dot(x.astype(jnp.bfloat16), w_ih_ref[...],
                 preferred_element_type=jnp.float32) + b_ih
    gh = jnp.dot(h.astype(jnp.bfloat16), w_hh_ref[...],
                 preferred_element_type=jnp.float32) + b_hh

    r = jax.nn.sigmoid(gi[:, 0:H] + gh[:, 0:H])
    z = jax.nn.sigmoid(gi[:, GP:GP + H] + gh[:, GP:GP + H])
    n = jnp.tanh(gi[:, 2 * GP:2 * GP + H] + r * gh[:, 2 * GP:2 * GP + H])
    h_new = n + z * (h - n)                                   # == (1-z)*n + z*h

    # fc2 as VPU multiply + lane reduction (no 1-lane MXU matmul)
    v_ref[...] = jnp.sum(h_new * w2_row, axis=-1, keepdims=True) + b2
    hout_ref[...] = h_new


def ppo_critic_forward(inputs, hidden, params):
    """Single GRUCell step: inputs (B, D_in), hidden (B*, H) -> (value (B,1), h (B,H)).

    NOTE: if this is called repeatedly in a JAX-level loop, route callers through
    ppo_critic_rollout instead — one pallas_call per step re-DMAs weights + h every step.
    """
    H = params["w1"].shape[1]
    B = inputs.shape[0]
    h_in = hidden.reshape(-1, H).astype(jnp.float32)
    x = inputs.astype(jnp.bfloat16)

    vmem = pl.BlockSpec(memory_space=pltpu.MemorySpace.VMEM)
    v, h = pl.pallas_call(
        ppo_critic_step_kernel,
        out_shape=(
            jax.ShapeDtypeStruct((B, 1), jnp.float32),
            jax.ShapeDtypeStruct((B, H), jnp.float32),
        ),
        in_specs=[vmem] * 6,
        out_specs=(vmem, vmem),
    )(x, h_in, params["w1"], params["w_ih"], params["w_hh"], params["misc"])
    return v, h


# ------------------------------ rollout kernel --------------------------------
def ppo_critic_rollout_kernel(
    xs_ref,       # (T*B, D_in) bf16  — whole rollout, resident in VMEM
    h0_ref,       # (B, H)      f32
    w1_ref,       # (D_in, H)   bf16
    w_ih_ref,     # (H, 3*GP)   bf16
    w_hh_ref,     # (H, 3*GP)   bf16
    misc_ref,     # (5, 3*GP)   f32
    v_ref,        # (T, B)      f32 out  (lane-dense, written once)
    hout_ref,     # (B, H)      f32 out  (last hidden)
    hs_ref,       # (T, B, H)   f32 VMEM scratch — per-step hidden states
):
    TB = xs_ref.shape[0]
    B, H = h0_ref.shape
    T = TB // B
    GP = w_hh_ref.shape[-1] // 3

    b_ih = misc_ref[0:1, :]
    b_hh = misc_ref[1:2, :]
    b1 = misc_ref[2:3, 0:H]
    w2_row = misc_ref[3:4, 0:H]
    b2 = misc_ref[4:5, 0:1]

    # ---- prologue (off the recurrence): fc1+ReLU and the GRU input projection
    #      for all T timesteps at once (T*B MXU rows instead of B).
    x_all = jnp.dot(xs_ref[...], w1_ref[...], preferred_element_type=jnp.float32) + b1
    x_all = jnp.maximum(x_all, 0.0)
    gi_all = jnp.dot(x_all.astype(jnp.bfloat16), w_ih_ref[...],
                     preferred_element_type=jnp.float32) + b_ih          # (T*B, 3*GP)

    # ---- serial recurrence: only gh = h @ W_hh per step remains on the critical path.
    #      Static unroll (T is small); tile T per grid step for long rollouts.
    h = h0_ref[...]
    for t in range(T):
        gi = gi_all[t * B:(t + 1) * B, :]
        gh = jnp.dot(h.astype(jnp.bfloat16), w_hh_ref[...],
                     preferred_element_type=jnp.float32) + b_hh
        r = jax.nn.sigmoid(gi[:, 0:H] + gh[:, 0:H])
        z = jax.nn.sigmoid(gi[:, GP:GP + H] + gh[:, GP:GP + H])
        n = jnp.tanh(gi[:, 2 * GP:2 * GP + H] + r * gh[:, 2 * GP:2 * GP + H])
        h = n + z * (h - n)
        hs_ref[t] = h

    # ---- epilogue: fc2 hoisted out of the loop; one lane-dense (T, B) store.
    v_ref[...] = jnp.sum(hs_ref[...] * w2_row, axis=-1) + b2
    hout_ref[...] = h


def ppo_critic_rollout(xs, hidden, params):
    """Apply the critic over a rollout: xs (T, B, D_in) -> (values (T,B,1), last hidden (B,H))."""
    T, B, D_in = xs.shape
    H = params["w1"].shape[1]
    h0 = hidden.reshape(-1, H).astype(jnp.float32)
    xs2 = xs.reshape(T * B, D_in).astype(jnp.bfloat16)   # pre-cast: halves x DMA, no in-kernel cast

    vmem = pl.BlockSpec(memory_space=pltpu.MemorySpace.VMEM)
    v_tb, h_last = pl.pallas_call(
        ppo_critic_rollout_kernel,
        out_shape=(
            jax.ShapeDtypeStruct((T, B), jnp.float32),
            jax.ShapeDtypeStruct((B, H), jnp.float32),
        ),
        in_specs=[vmem] * 6,
        out_specs=(vmem, vmem),
        scratch_shapes=[pltpu.VMEM((T, B, H), jnp.float32)],
    )(xs2, h0, params["w1"], params["w_ih"], params["w_hh"], params["misc"])
    return v_tb.reshape(T, B, 1), h_last


# --------------------------- parameter init -----------------------------------
def _orthogonal(key, shape, gain=1.0):
    """Orthogonal init matching torch.nn.init.orthogonal_ shapes (out, in)."""
    rows, cols = shape
    n = max(rows, cols)
    a = jax.random.normal(key, (n, min(rows, cols)), dtype=jnp.float32)
    q, r = jnp.linalg.qr(a)
    q = q * jnp.sign(jnp.diag(r))
    q = q[:, :min(rows, cols)]
    if rows < cols:
        q = q.T
    return gain * q[:rows, :cols]


def make_params(key, d_in, H):
    """Returns (kernel_params, raw_pytorch_layout_params)."""
    GP = ((H + 127) // 128) * 128            # 128-aligned gate pitch
    ks = jax.random.split(key, 6)
    inv = 1.0 / jnp.sqrt(H)

    # fc1: orthogonal(std=1.0), bias 0  (PyTorch weight (H, d_in))
    w1_pt = _orthogonal(ks[0], (H, d_in), gain=1.0)
    b1 = jnp.zeros((H,), jnp.float32)

    # GRUCell: uniform(-1/sqrt(H), 1/sqrt(H)); PyTorch layouts (3H, H) / (3H,), gate order r|z|n
    w_ih_pt = jax.random.uniform(ks[1], (3 * H, H), jnp.float32, -inv, inv)
    w_hh_pt = jax.random.uniform(ks[2], (3 * H, H), jnp.float32, -inv, inv)
    b_ih = jax.random.uniform(ks[3], (3 * H,), jnp.float32, -inv, inv)
    b_hh = jax.random.uniform(ks[4], (3 * H,), jnp.float32, -inv, inv)

    # fc2: orthogonal(std=1.0), bias 0  (PyTorch weight (1, H))
    w2_pt = _orthogonal(ks[5], (1, H), gain=1.0)
    b2 = jnp.float32(0.0)

    # Kernel layouts: x @ W form; gate g occupies lanes [g*GP, g*GP+H), zeros elsewhere
    # (padded weight columns / bias lanes are zero and never read past the gate slices).
    def pad_gates(w_t):                       # (H, 3H) -> (H, 3*GP)
        out = jnp.zeros((H, 3 * GP), jnp.float32)
        for g in range(3):
            out = out.at[:, g * GP:g * GP + H].set(w_t[:, g * H:(g + 1) * H])
        return out

    def pad_gate_vec(b):                      # (3H,) -> (3*GP,)
        out = jnp.zeros((3 * GP,), jnp.float32)
        for g in range(3):
            out = out.at[g * GP:g * GP + H].set(b[g * H:(g + 1) * H])
        return out

    w_ih_k = pad_gates(w_ih_pt.T).astype(jnp.bfloat16)
    w_hh_k = pad_gates(w_hh_pt.T).astype(jnp.bfloat16)

    # One small f32 array for every bias + the fc2 row (single padded VMEM tile / DMA).
    misc = jnp.zeros((5, 3 * GP), jnp.float32)
    misc = misc.at[0, :].set(pad_gate_vec(b_ih))
    misc = misc.at[1, :].set(pad_gate_vec(b_hh))
    misc = misc.at[2, :H].set(b1)
    misc = misc.at[3, :H].set(w2_pt[0])
    misc = misc.at[4, 0].set(b2)

    params = dict(w1=w1_pt.T.astype(jnp.bfloat16), w_ih=w_ih_k, w_hh=w_hh_k, misc=misc)
    raw = dict(w1=w1_pt, b1=b1, w_ih=w_ih_pt, w_hh=w_hh_pt, b_ih=b_ih, b_hh=b_hh,
               w2=w2_pt, b2=b2)
    return params, raw


# -------------------------- pure-JAX reference --------------------------------
def ppo_critic_step_ref(x, h, raw):
    """Reference on raw PyTorch-layout params, mirroring the kernel's
    bf16-matmul-input / f32-accumulate numerics (validates the padded packing)."""
    H = raw["w_hh"].shape[1]
    bf = jnp.bfloat16
    x1 = jnp.dot(x.astype(bf), raw["w1"].T.astype(bf),
                 preferred_element_type=jnp.float32) + raw["b1"]
    x1 = jnp.maximum(x1, 0.0)
    gi = jnp.dot(x1.astype(bf), raw["w_ih"].T.astype(bf),
                 preferred_element_type=jnp.float32) + raw["b_ih"]
    gh = jnp.dot(h.astype(bf), raw["w_hh"].T.astype(bf),
                 preferred_element_type=jnp.float32) + raw["b_hh"]
    r = jax.nn.sigmoid(gi[:, :H] + gh[:, :H])
    z = jax.nn.sigmoid(gi[:, H:2 * H] + gh[:, H:2 * H])
    n = jnp.tanh(gi[:, 2 * H:] + r * gh[:, 2 * H:])       # b_hn stays inside gated term
    h_new = n + z * (h - n)
    v = jnp.sum(h_new * raw["w2"][0], axis=-1, keepdims=True) + raw["b2"]
    return v, h_new


if __name__ == "__main__":
    B, D_IN, H, T = 8, 48, 32, 6   # batch, critic_input_shape, args.rnn_hidden_dim, rollout len

    key = jax.random.PRNGKey(0)
    k_x, k_h, k_xs, k_p = jax.random.split(key, 4)

    inputs = jax.random.normal(k_x, (B, D_IN), dtype=jnp.float32)
    hidden = jax.random.normal(k_h, (B, H), dtype=jnp.float32)
    xs = jax.random.normal(k_xs, (T, B, D_IN), dtype=jnp.float32)
    params, raw = make_params(k_p, D_IN, H)

    # --- single GRUCell step (matches PPOCritic.forward) ---
    v, h_new = ppo_critic_forward(inputs, hidden, params)
    jax.block_until_ready((v, h_new))
    v_ref, h_ref = ppo_critic_step_ref(inputs, hidden, raw)
    assert v.shape == (B, 1) and h_new.shape == (B, H)
    assert jnp.allclose(v, v_ref, atol=2e-3, rtol=2e-3)
    assert jnp.allclose(h_new, h_ref, atol=2e-3, rtol=2e-3)

    # --- rollout over T steps: one pallas_call, weights + xs VMEM-resident, in-kernel time loop ---
    vs, h_last = ppo_critic_rollout(xs, hidden, params)
    jax.block_until_ready((vs, h_last))

    def scan_step(h, x):
        v_t, h_t = ppo_critic_step_ref(x, h, raw)
        return h_t, v_t

    h_last_ref, vs_ref = jax.lax.scan(scan_step, hidden, xs)
    assert vs.shape == (T, B, 1) and h_last.shape == (B, H)
    assert jnp.allclose(vs, vs_ref, atol=5e-3, rtol=5e-3)
    assert jnp.allclose(h_last, h_last_ref, atol=5e-3, rtol=5e-3)

    print("KERNEL_OK")
</pallas_src>

<mosaic_0001>
module attributes {stable_mosaic.version = 11 : i64} {
  func.func @ppo_critic_step_kernel(%arg0: memref<8x48xbf16, #tpu.memory_space<vmem>>, %arg1: memref<8x32xf32, #tpu.memory_space<vmem>>, %arg2: memref<48x32xbf16, #tpu.memory_space<vmem>>, %arg3: memref<32x384xbf16, #tpu.memory_space<vmem>>, %arg4: memref<32x384xbf16, #tpu.memory_space<vmem>>, %arg5: memref<5x384xf32, #tpu.memory_space<vmem>>, %arg6: memref<8x1xf32, #tpu.memory_space<vmem>>, %arg7: memref<8x32xf32, #tpu.memory_space<vmem>>) attributes {dimension_semantics = [], scalar_prefetch = 0 : i64, scratch_operands = 0 : i64, tpu.core_type = #tpu.core_type<tc>} {
    %c0 = arith.constant 0 : index
    %c0_0 = arith.constant 0 : index
    %0 = vector.load %arg1[%c0, %c0_0] : memref<8x32xf32, #tpu.memory_space<vmem>>, vector<8x32xf32>
    %c0_1 = arith.constant 0 : index
    %c0_2 = arith.constant 0 : index
    %1 = vector.load %arg5[%c0_1, %c0_2] : memref<5x384xf32, #tpu.memory_space<vmem>>, vector<1x384xf32>
    %c1 = arith.constant 1 : index
    %c0_3 = arith.constant 0 : index
    %2 = vector.load %arg5[%c1, %c0_3] : memref<5x384xf32, #tpu.memory_space<vmem>>, vector<1x384xf32>
    %c2 = arith.constant 2 : index
    %c0_4 = arith.constant 0 : index
    %3 = vector.load %arg5[%c2, %c0_4] : memref<5x384xf32, #tpu.memory_space<vmem>>, vector<1x32xf32>
    %c3 = arith.constant 3 : index
    %c0_5 = arith.constant 0 : index
    %4 = vector.load %arg5[%c3, %c0_5] : memref<5x384xf32, #tpu.memory_space<vmem>>, vector<1x32xf32>
    %c4 = arith.constant 4 : index
    %c0_6 = arith.constant 0 : index
    %5 = vector.load %arg5[%c4, %c0_6] : memref<5x384xf32, #tpu.memory_space<vmem>>, vector<1x1xf32>
    %c0_7 = arith.constant 0 : index
    %c0_8 = arith.constant 0 : index
    %6 = vector.load %arg0[%c0_7, %c0_8] : memref<8x48xbf16, #tpu.memory_space<vmem>>, vector<8x48xbf16>
    %c0_9 = arith.constant 0 : index
    %c0_10 = arith.constant 0 : index
    %7 = vector.load %arg2[%c0_9, %c0_10] : memref<48x32xbf16, #tpu.memory_space<vmem>>, vector<48x32xbf16>
    %cst = arith.constant dense<0.000000e+00> : vector<8x32xf32>
    %8 = tpu.matmul %6, %7, %cst {dimension_numbers = #tpu.dot_dimension_numbers<[1], [0], [0], [1], [0, 0, 1, 1], [], []>} : vector<8x48xbf16>, vector<48x32xbf16>, vector<8x32xf32> -> vector<8x32xf32>
    %9 = vector.broadcast %3 : vector<1x32xf32> to vector<8x32xf32>
    %10 = arith.addf %8, %9 : vector<8x32xf32>
    %cst_11 = arith.constant 0.000000e+00 : f32
    %11 = vector.broadcast %cst_11 : f32 to vector<8x32xf32>
    %12 = arith.maximumf %10, %11 : vector<8x32xf32>
    %13 = arith.truncf %12 : vector<8x32xf32> to vector<8x32xbf16>
    %c0_12 = arith.constant 0 : index
    %c0_13 = arith.constant 0 : index
    %14 = vector.load %arg3[%c0_12, %c0_13] : memref<32x384xbf16, #tpu.memory_space<vmem>>, vector<32x384xbf16>
    %cst_14 = arith.constant dense<0.000000e+00> : vector<8x384xf32>
    %15 = tpu.matmul %13, %14, %cst_14 {dimension_numbers = #tpu.dot_dimension_numbers<[1], [0], [0], [1], [0, 0, 1, 1], [], []>} : vector<8x32xbf16>, vector<32x384xbf16>, vector<8x384xf32> -> vector<8x384xf32>
    %16 = vector.broadcast %1 : vector<1x384xf32> to vector<8x384xf32>
    %17 = arith.addf %15, %16 : vector<8x384xf32>
    %18 = arith.truncf %0 : vector<8x32xf32> to vector<8x32xbf16>
    %c0_15 = arith.constant 0 : index
    %c0_16 = arith.constant 0 : index
    %19 = vector.load %arg4[%c0_15, %c0_16] : memref<32x384xbf16, #tpu.memory_space<vmem>>, vector<32x384xbf16>
    %cst_17 = arith.constant dense<0.000000e+00> : vector<8x384xf32>
    %20 = tpu.matmul %18, %19, %cst_17 {dimension_numbers = #tpu.dot_dimension_numbers<[1], [0], [0], [1], [0, 0, 1, 1], [], []>} : vector<8x32xbf16>, vector<32x384xbf16>, vector<8x384xf32> -> vector<8x384xf32>
    %21 = vector.broadcast %2 : vector<1x384xf32> to vector<8x384xf32>
    %22 = arith.addf %20, %21 : vector<8x384xf32>
    %23 = vector.extract_strided_slice %17 {offsets = [0, 0], sizes = [8, 32], strides = [1, 1]} : vector<8x384xf32> to vector<8x32xf32>
    %24 = vector.extract_strided_slice %22 {offsets = [0, 0], sizes = [8, 32], strides = [1, 1]} : vector<8x384xf32> to vector<8x32xf32>
    %25 = arith.addf %23, %24 : vector<8x32xf32>
    %26 = arith.negf %25 : vector<8x32xf32>
    %27 = math.exp %26 : vector<8x32xf32>
    %cst_18 = arith.constant 1.000000e+00 : f32
    %28 = vector.broadcast %cst_18 : f32 to vector<8x32xf32>
    %29 = arith.addf %28, %27 : vector<8x32xf32>
    %30 = arith.divf %28, %29 : vector<8x32xf32>
    %31 = vector.extract_strided_slice %17 {offsets = [0, 128], sizes = [8, 32], strides = [1, 1]} : vector<8x384xf32> to vector<8x32xf32>
    %32 = vector.extract_strided_slice %22 {offsets = [0, 128], sizes = [8, 32], strides = [1, 1]} : vector<8x384xf32> to vector<8x32xf32>
    %33 = arith.addf %31, %32 : vector<8x32xf32>
    %34 = arith.negf %33 : vector<8x32xf32>
    %35 = math.exp %34 : vector<8x32xf32>
    %cst_19 = arith.constant 1.000000e+00 : f32
    %36 = vector.broadcast %cst_19 : f32 to vector<8x32xf32>
    %37 = arith.addf %36, %35 : vector<8x32xf32>
    %38 = arith.divf %36, %37 : vector<8x32xf32>
    %39 = vector.extract_strided_slice %17 {offsets = [0, 256], sizes = [8, 32], strides = [1, 1]} : vector<8x384xf32> to vector<8x32xf32>
    %40 = vector.extract_strided_slice %22 {offsets = [0, 256], sizes = [8, 32], strides = [1, 1]} : vector<8x384xf32> to vector<8x32xf32>
    %41 = arith.mulf %30, %40 : vector<8x32xf32>
    %42 = arith.addf %39, %41 : vector<8x32xf32>
    %43 = math.tanh %42 : vector<8x32xf32>
    %44 = arith.subf %0, %43 : vector<8x32xf32>
    %45 = arith.mulf %38, %44 : vector<8x32xf32>
    %46 = arith.addf %43, %45 : vector<8x32xf32>
    %47 = vector.broadcast %4 : vector<1x32xf32> to vector<8x32xf32>
    %48 = arith.mulf %46, %47 : vector<8x32xf32>
    %cst_20 = arith.constant dense<0.000000e+00> : vector<8xf32>
    %49 = vector.multi_reduction <add>, %48, %cst_20 [1] : vector<8x32xf32> to vector<8xf32>
    %50 = vector.shape_cast %49 : vector<8xf32> to vector<8x1xf32>
    %51 = vector.broadcast %5 : vector<1x1xf32> to vector<8x1xf32>
    %52 = arith.addf %50, %51 : vector<8x1xf32>
    %c0_21 = arith.constant 0 : index
    %c0_22 = arith.constant 0 : index
    %53 = vector.load %arg6[%c0_21, %c0_22] : memref<8x1xf32, #tpu.memory_space<vmem>>, vector<8x1xf32>
    tpu.vector_store %arg6[%c0_21, %c0_22], %52 {strides = array<i32>} : memref<8x1xf32, #tpu.memory_space<vmem>>, vector<8x1xf32>,
    %c0_23 = arith.constant 0 : index
    %c0_24 = arith.constant 0 : index
    %54 = vector.load %arg7[%c0_23, %c0_24] : memref<8x32xf32, #tpu.memory_space<vmem>>, vector<8x32xf32>
    tpu.vector_store %arg7[%c0_23, %c0_24], %46 {strides = array<i32>} : memref<8x32xf32, #tpu.memory_space<vmem>>, vector<8x32xf32>,
    return
  }
}

</mosaic_0001>

<bundles_post_ra>
// kernel: tpu_custom_call.1
= control target key start
LH: loop header
LB: loop body
LE: loop exit
PB: predicated region body
PF: predicated region fallthrough
CT: control target
= control target key end

     0   :  { %13 = vsyncpa [#allocation3], 0  ;;  %s644_s0 = inlined_call_operand.vmem [shape: bf16[8,48], index: 0, kind: input, shape index: {}]   ;;  %s645_s1 = inlined_call_operand.vmem [shape: f32[8,32], index: 1, kind: input, shape index: {}]   ;;  %s646_s2 = inlined_call_operand.vmem [shape: bf16[48,32], index: 2, kind: input, shape index: {}]   ;;  %s647_s3 = inlined_call_operand.hbm [shape: bf16[32,384], index: 3, kind: input, shape index: {}]   ;;  %s648_s4 = inlined_call_operand.hbm [shape: bf16[32,384], index: 4, kind: input, shape index: {}]   ;;  %s649_s5 = inlined_call_operand.vmem [shape: f32[5,384], index: 5, kind: input, shape index: {}]   ;;  %s650_s6 = inlined_call_operand.vmem [shape: f32[8,1], index: 6, kind: output, shape index: {0}]   ;;  %s651_s7 = inlined_call_operand.hbm [shape: f32[8,32], index: 7, kind: output, shape index: {1}]  }
   0x1   :  { %14 = vsyncpa [#allocation6], 0 }
   0x2   :  { %15 = vsyncpa [#allocation4], 0  ;;  %s26_s26 = sshll.u32 %s647_s3, 4  ;;  %s544_s27 = smov [#allocation2]   ;;  %s27_s26 = int_to_ptr.hbm [resolvable:$true] %s26_s26 }
   0x3   :  { %s28_s28 = sshll.u32 %s544_s27, 4  ;;  %s39_s8 = sshll.u32 %s648_s4, 4  ;;  %s29_s28 = int_to_ptr.vmem [resolvable:$true] %s28_s28  ;;  %s40_s8 = int_to_ptr.hbm [resolvable:$true] %s39_s8 }
   0x4   :  { %s545_s9 = smov 192   ;;  %s546_s10 = smov 12  }
   0x5   :  { %34 = dma.hbm_to_vmem [thread:$0]  %s27_s26, 768, %s29_s28, [#allocation3], %s545_s9, %s545_s9, %s546_s10  }
   0x6   :  { %s547_s11 = smov [#allocation5]  }
   0x7   :  { %s41_s12 = sshll.u32 %s547_s11, 4  ;;  %s42_s12 = int_to_ptr.vmem [resolvable:$true] %s41_s12 }
   0x8   :  { %47 = dma.hbm_to_vmem [thread:$0]  %s40_s8, 768, %s42_s12, [#allocation6], %s545_s9, %s545_s9, %s546_s10  }
   0x9   :  { %538 = dma.done.wait [#allocation3], 768  }
   0xa   :  { %539 = vsyncadd [#allocation3], 4294966528 }
   0xb   :  { %540 = dma.done.wait [#allocation6], 768  }
   0xc   :  { %541 = vsyncadd [#allocation6], 4294966528  ;;  %v438_v0 = vld [vmem:[%s646_s2 + $0x10] sm:$0xff]  ;;  %v437_v1 = vld [vmem:[%s646_s2 + $0x8] sm:$0xff]  ;;  %vm91_vm0 = vcmask 392192   ;;  %vm157_vm1 = vcmask 261120  }
   0xd   :  { %100 = vmatpush.bf16.msra.mxu0 %v438_v0  ;;  %v436_v2 = vld [vmem:[%s646_s2] sm:$0xff]  ;;  %v394_v4 = vld [vmem:[#allocation2 + $0x18] sm:$0xf]  ;;  %v442_v6 = vld [vmem:[#allocation2 + $0x1c] sm:$0xf]  ;;  %s548_s24 = smov [#allocation7]  }
   0xe   :  { %v66_v3 = vld [vmem:[%s644_s0] sm:$0xf]  ;;  %v443_v5 = vld [vmem:[#allocation2 + $0x20] sm:$0xf0]  ;;  %v396_v8 = vld [vmem:[#allocation2 + $0x24] sm:$0xf0] }
   0xf   :  { %v395_v7 = vor.u32 %v443_v5, %v394_v4  ;;  %v402_v9 = vld [vmem:[#allocation2 + $0x20] sm:$0xf]  ;;  %v444_v10 = vld [vmem:[#allocation2 + $0x28] sm:$0xf0]  ;;  %v399_v11 = vor.u32 %v442_v6, %v396_v8  ;;  %v439_v15 = vld [vmem:[#allocation2 + $0x4] sm:$0xf] }
  0x10   :  { %v403_v12 = vor.u32 %v444_v10, %v402_v9  ;;  %v382_v13 = vld [vmem:[#allocation2] sm:$0xf]  ;;  %v440_v14 = vld [vmem:[#allocation2 + $0x8] sm:$0xf0]  ;;  %v384_v17 = vld [vmem:[#allocation2 + $0xc] sm:$0xf0] }
  0x11   :  { %101 = vmatpush.bf16.msra.mxu0 %v437_v1  ;;  %167 = vmatpush.bf16.msra.mxu1 %v395_v7  ;;  %v383_v16 = vor.u32 %v440_v14, %v382_v13  ;;  %v390_v18 = vld [vmem:[#allocation2 + $0x8] sm:$0xf]  ;;  %v441_v19 = vld [vmem:[#allocation2 + $0x10] sm:$0xf0]  ;;  %v387_v20 = vor.u32 %v439_v15, %v384_v17  ;;  %v448_v24 = vld [vmem:[#allocation5 + $0x1c] sm:$0xf] }
  0x12   :  { %180 = vmatpush.bf16.msra.mxu2 %v399_v11  ;;  %193 = vmatpush.bf16.msra.mxu3 %v403_v12  ;;  %v391_v21 = vor.u32 %v441_v19, %v390_v18  ;;  %v421_v22 = vld [vmem:[#allocation5 + $0x18] sm:$0xf]  ;;  %v449_v23 = vld [vmem:[#allocation5 + $0x20] sm:$0xf0]  ;;  %v423_v26 = vld [vmem:[#allocation5 + $0x24] sm:$0xf0] }
  0x13   :  { %v422_v25 = vor.u32 %v449_v23, %v421_v22  ;;  %v409_v27 = vld [vmem:[#allocation5] sm:$0xf]  ;;  %v446_v28 = vld [vmem:[#allocation5 + $0x8] sm:$0xf0]  ;;  %v426_v29 = vor.u32 %v448_v24, %v423_v26  ;;  %v445_v30 = vld [vmem:[#allocation5 + $0x4] sm:$0xf] }
  0x14   :  { %v411_v31 = vld [vmem:[#allocation5 + $0xc] sm:$0xf0]  ;;  %v410_v32 = vor.u32 %v446_v28, %v409_v27  ;;  %v429_v34 = vld [vmem:[#allocation5 + $0x20] sm:$0xf]  ;;  %v450_v35 = vld [vmem:[#allocation5 + $0x28] sm:$0xf0] }
  0x15   :  { %102 = vmatpush.bf16.msra.mxu0 %v436_v2  ;;  %168 = vmatpush.bf16.msra.mxu1 %v383_v16  ;;  %v414_v33 = vor.u32 %v445_v30, %v411_v31  ;;  %v417_v36 = vld [vmem:[#allocation5 + $0x8] sm:$0xf]  ;;  %v430_v37 = vor.u32 %v450_v35, %v429_v34  ;;  %v447_v38 = vld [vmem:[#allocation5 + $0x10] sm:$0xf0]  ;;  %v63_v40 = vld [vmem:[%s649_s5 + $0x2] ss:$0 sm:$0xff] }
  0x16   :  { %181 = vmatpush.bf16.msra.mxu2 %v387_v20  ;;  %194 = vmatpush.bf16.msra.mxu3 %v391_v21  ;;  %v418_v39 = vor.u32 %v447_v38, %v417_v36  ;;  %v616_v46 = vld [vmem:[%s645_s1] sm:$0xff]  ;;  %s351_s25 = sshll.u32 %s548_s24, 4  ;;  %s353_s28 = sshll.u32 %s651_s7, 4  ;;  %vm341_vm10 = vcmask 7168   ;;  %s352_s25 = int_to_ptr.vmem [resolvable:$true] %s351_s25  ;;  %s354_s28 = int_to_ptr.hbm [resolvable:$true] %s353_s28 }
  0x17   :  { %v200_v47 = vpack.c.bf16 %v616_v46, %v616_v46  ;;  %v60_v52 = vld [vmem:[%s649_s5] ss:$8 sm:$0x7]  ;;  %v366_v53 = vld [vmem:[%s649_s5 + $0x1] ss:$8 sm:$0x7] }
  0x18   :  { %379 = vmatmul.msk.bf16.vlgmr.msra.gmra.mxu0 %vm91_vm0, %v66_v3  ;;  %v119_v54 = vperm.slane %v60_v52, 0  ;;  %v210_v55 = vperm.slane %v366_v53, 0  ;;  %v120_v61 = vperm.slane %v60_v52, 1  ;;  %v211_v63 = vperm.slane %v366_v53, 1 }
  0x19   :  { %257 = vmatpush.bf16.msrb.mxu1 %v422_v25  ;;  %v212_v16 = vperm.slane %v366_v53, 2  ;;  %v121_v22 = vperm.slane %v60_v52, 2 }
  0x1a   :  { %270 = vmatpush.bf16.msrb.mxu2 %v426_v29  ;;  %283 = vmatpush.bf16.msrb.mxu3 %v430_v37 }
  0x1d   :  { %258 = vmatpush.bf16.msrb.mxu1 %v410_v32 }
  0x1e   :  { %271 = vmatpush.bf16.msrb.mxu2 %v414_v33  ;;  %284 = vmatpush.bf16.msrb.mxu3 %v418_v39 }
  0x95   :  { %v104_v41 = vpop.f32.mrf.mxu0 }
  0x96   :  { %v105_v42 = vadd.f32 %v104_v41, %v63_v40 }
  0x98   :  { %v108_v43 = vmax.f32 %v105_v42, 0.0 }
  0x9a   :  { %v109_v44 = vpack.c.bf16 %v108_v43, %v108_v43  ;;  %v64_v43 = vld [vmem:[%s649_s5 + $0x3] ss:$0 sm:$0xff] }
  0x9c   :  { %404 = vmatmul.msk.bf16.vlgmr.msra.gmra.mxu1 %vm157_vm1, %v109_v44  ;;  %405 = vmatmul.msk.bf16.vlgmr.msra.gmra.mxu2 %vm157_vm1, %v109_v44 }
  0x9d   :  { %406 = vmatmul.msk.bf16.vlgmr.msra.gmra.mxu3 %vm157_vm1, %v109_v44  ;;  %v106_v45 = vpop.f32.mrf.mxu0 }
  0xac   :  { %431 = vmatmul.msk.bf16.vlgmr.msrb.gmra.mxu1 %vm157_vm1, %v200_v47  ;;  %432 = vmatmul.msk.bf16.vlgmr.msrb.gmra.mxu2 %vm157_vm1, %v200_v47 }
  0xad   :  { %433 = vmatmul.msk.bf16.vlgmr.msrb.gmra.mxu3 %vm157_vm1, %v200_v47  ;;  %v65_v47 = vld [vmem:[%s649_s5 + $0x4] ss:$0 sm:$0xff] }
 0x119   :  { %v170_v48 = vpop.f32.mrf.mxu1 }
 0x11a   :  { %v171_v59 = vadd.f32 %v170_v48, %v119_v54 }
 0x11f   :  { %v183_v49 = vpop.f32.mrf.mxu2 }
 0x120   :  { %v196_v50 = vpop.f32.mrf.mxu3  ;;  %v184_v2 = vadd.f32 %v183_v49, %v120_v61 }
 0x121   :  { %v172_v51 = vpop.f32.mrf.mxu1  ;;  %v197_v30 = vadd.f32 %v196_v50, %v121_v22 }
 0x127   :  { %v185_v56 = vpop.f32.mrf.mxu2 }
 0x128   :  { %v198_v57 = vpop.f32.mrf.mxu3 }
 0x129   :  { %v260_v58 = vpop.f32.mrf.mxu1 }
 0x12a   :  { %v261_v60 = vadd.f32 %v260_v58, %v210_v55 }
 0x12c   :  { %v290_v62 = vadd.f32 %v261_v60, %v171_v59 }
 0x12e   :  { %v434_v0 = vmul.f32 -1.442695, %v290_v62 }
 0x12f   :  { %v273_v1 = vpop.f32.mrf.mxu2 }
 0x130   :  { %456 = vpow2.f32 %v434_v0  ;;  %v274_v3 = vadd.f32 %v273_v1, %v211_v63  ;;  %v286_v4 = vpop.f32.mrf.mxu3 }
 0x131   :  { %v262_v5 = vpop.f32.mrf.mxu1  ;;  %v287_v24 = vadd.f32 %v286_v4, %v212_v16 }
 0x132   :  { %v310_v6 = vadd.f32 %v274_v3, %v184_v2 }
 0x134   :  { %v435_v7 = vmul.f32 -1.442695, %v310_v6 }
 0x136   :  { %v457_v8 = vpop.eup %456  ;;  %458 = vpow2.f32 %v435_v7 }
 0x137   :  { %v294_v9 = vadd.f32 1.0, %v457_v8  ;;  %v275_v10 = vpop.f32.mrf.mxu2 }
 0x138   :  { %v288_v11 = vpop.f32.mrf.mxu3 }
 0x139   :  { %460 = vrcp.f32 %v294_v9  ;;  %v306_v18 = vand.u32 2147483648, %v294_v9  ;;  %v304_v20 = vand.u32 2147483647, %v294_v9  ;;  %vm300_vm3 = vweird.f32 %v294_v9 }
 0x13b   :  { %v307_v26 = vor.u32 1.1754944e-38, %v306_v18  ;;  %vm305_vm5 = vcmp.eq.f32.partialorder %v304_v20, 8.507059e+37 }
 0x13c   :  { %v459_v12 = vpop.eup %458 }
 0x13d   :  { %v314_v13 = vadd.f32 1.0, %v459_v12 }
 0x13f   :  { %v461_v14 = vpop.eup %460  ;;  %462 = vrcp.f32 %v314_v13  ;;  %v326_v35 = vand.u32 2147483648, %v314_v13  ;;  %vm320_vm7 = vweird.f32 %v314_v13  ;;  %v324_v36 = vand.u32 2147483647, %v314_v13 }
 0x140   :  { %v296_v15 = vmul.f32 %v461_v14, %v294_v9  ;;  %vm301_vm2 = vweird.f32 %v461_v14 }
 0x141   :  { %vm302_vm4 = vmor %vm300_vm3, %vm301_vm2  ;;  %v327_v39 = vor.u32 1.1754944e-38, %v326_v35  ;;  %vm325_vm9 = vcmp.eq.f32.partialorder %v324_v36, 8.507059e+37 }
 0x142   :  { %v297_v17 = vsub.f32 1.0, %v296_v15 }
 0x144   :  { %v298_v19 = vmul.f32 %v461_v14, %v297_v17 }
 0x145   :  { %v463_v21 = vpop.eup %462 }
 0x146   :  { %v316_v23 = vmul.f32 %v463_v21, %v314_v13  ;;  %v299_v25 = vadd.f32 %v461_v14, %v298_v19  ;;  %vm321_vm6 = vweird.f32 %v463_v21 }
 0x147   :  { %vm322_vm8 = vmor %vm320_vm7, %vm321_vm6 }
 0x148   :  { %v303_v27 = vsel %vm302_vm4, %v461_v14, %v299_v25  ;;  %v317_v28 = vsub.f32 1.0, %v316_v23 }
 0x149   :  { %v308_v29 = vsel %vm305_vm5, %v307_v26, %v303_v27 }
 0x14a   :  { %v330_v31 = vmul.f32 %v308_v29, %v287_v24  ;;  %v318_v32 = vmul.f32 %v463_v21, %v317_v28 }
 0x14c   :  { %v331_v33 = vadd.f32 %v330_v31, %v197_v30  ;;  %v319_v34 = vadd.f32 %v463_v21, %v318_v32 }
 0x14e   :  { %464 = vtanh.f32 %v331_v33  ;;  %v323_v37 = vsel %vm322_vm8, %v463_v21, %v319_v34 }
 0x14f   :  { %v328_v41 = vsel %vm325_vm9, %v327_v39, %v323_v37 }
 0x154   :  { %v465_v38 = vpop.eup %464 }
 0x155   :  { %v333_v40 = vsub.f32 %v616_v46, %v465_v38 }
 0x157   :  { %v334_v42 = vmul.f32 %v333_v40, %v328_v41 }
 0x159   :  { %v335_v44 = vadd.f32 %v465_v38, %v334_v42 }
 0x15b   :  { %v336_v45 = vmul.f32 %v335_v44, %v64_v43  ;;  %343 = vst.msk [vmem:[#allocation7] sm:$0xff] %vm157_vm1, %v335_v44 }
 0x15c   :  { %356 = dma.vmem_to_hbm [thread:$0]  %s352_s25, 128, %s354_s28, [#allocation4]  }
 0x15d   :  { %v337_v46 = vsel %vm157_vm1, %v336_v45, 0.0 }
 0x15e   :  { %338 = vadd.xlane.f32.xlu0 %v337_v46 }
 0x1d1   :  { %v339_v48 = vpop.xlane.xlu0 %338 }
 0x1d2   :  { %v340_v49 = vadd.f32 %v339_v48, %v65_v47 }
 0x1d4   :  { %342 = vst.msk [vmem:[%s650_s6] sm:$0xff] %vm341_vm10, %v340_v49 }
 0x1d5   :  { %542 = dma.done.wait [#allocation4], 128  }
 0x1d6   :  { %543 = vsyncadd [#allocation4], 4294967168 }
 0x1d7   :  { %363 = vsyncpa [#allocation3], 1 }
 0x1d8   :  { %364 = vsyncpa [#allocation6], 1 }
 0x1d9   :  { %365 = vsyncpa [#allocation4], 1 }

</bundles_post_ra>
